<compile_context>
chip_gen: v6e
topology: v6e:2x2x1
jax: 0.10.0
libtpu: 0.0.40
codegen_flags: <defaults>
</compile_context>

<pallas_src>
import functools

import jax
import jax.numpy as jnp
from jax.experimental import pallas as pl
from jax.experimental.pallas import tpu as pltpu

_LANES = 128


def _round_up(n: int, m: int) -> int:
    return ((n + m - 1) // m) * m


@functools.lru_cache(maxsize=1)
def _default_block_bytes() -> int:
    """~2 MiB blocks on v5* (16 MiB scoped VMEM default), ~4 MiB elsewhere."""
    try:
        kind = jax.devices()[0].device_kind.lower()
    except Exception:  # pragma: no cover - defensive
        return 2 * 1024 * 1024
    if "v5" in kind:
        return 2 * 1024 * 1024
    return 4 * 1024 * 1024  # v6e / v7x: 4 buffers live = 16 MiB < 32 MiB scoped


def _sublane(dtype) -> int:
    itemsize = jnp.dtype(dtype).itemsize
    return {4: 8, 2: 16, 1: 32}.get(itemsize, 8)


def _clipped_relu_kernel(thr_ref, x_ref, o_ref):
    # thr_ref lives in SMEM; scalar read, broadcast by the compare.
    t = thr_ref[0]
    x = x_ref[...]
    # Keep original predicate order so NaN passes through (NaN <= t is False).
    o_ref[...] = jnp.where(x <= t, jnp.zeros((), dtype=x.dtype), x)


def clipped_relu_pallas(x: jax.Array, threshold_x: jax.Array) -> jax.Array:
    """Elementwise clipped ReLU: where(x <= threshold_x, 0, x)."""
    orig_shape = x.shape
    n_elem = x.size
    thr = jnp.asarray(threshold_x, dtype=x.dtype)

    sub = _sublane(x.dtype)
    # Fast path: empty / tiny / non-lane-aligned flat size -> XLA-fused where.
    if n_elem == 0 or (n_elem % _LANES) != 0 or n_elem < sub * _LANES:
        return jnp.where(x <= thr, jnp.zeros((), dtype=x.dtype), x)

    rows = n_elem // _LANES
    x2d = x.reshape(rows, _LANES)  # contiguous reshape: metadata-only under jit

    itemsize = jnp.dtype(x.dtype).itemsize
    block_bytes = _default_block_bytes()
    target_rows = max(sub, (block_bytes // (_LANES * itemsize)) // sub * sub)
    # >= 2 grid steps when the array allows it (v7x 2-TC sharding), capped by
    # the per-generation block-byte target.
    tile_rows = max(sub, min(target_rows, _round_up(pl.cdiv(rows, 2), sub)))

    # Nudge the grid count to be even so both v7x TensorCores get equal work.
    num_blocks = pl.cdiv(rows, tile_rows)
    if num_blocks > 1 and num_blocks % 2 == 1:
        tile_rows = max(sub, _round_up(pl.cdiv(rows, num_blocks + 1), sub))
        num_blocks = pl.cdiv(rows, tile_rows)

    grid = (num_blocks,)  # ragged last block is masked by Pallas

    out2d = pl.pallas_call(
        _clipped_relu_kernel,
        out_shape=jax.ShapeDtypeStruct((rows, _LANES), x.dtype),
        grid_spec=pl.GridSpec(
            grid=grid,
            in_specs=[
                pl.BlockSpec(memory_space=pltpu.MemorySpace.SMEM),  # threshold
                pl.BlockSpec((tile_rows, _LANES), lambda i: (i, 0)),
            ],
            out_specs=pl.BlockSpec((tile_rows, _LANES), lambda i: (i, 0)),
        ),
        compiler_params=pltpu.CompilerParams(
            dimension_semantics=("parallel",)),
        cost_estimate=pl.CostEstimate(
            flops=n_elem,
            transcendentals=0,
            bytes_accessed=2 * n_elem * itemsize),
    )(thr.reshape(1), x2d)

    return out2d.reshape(orig_shape)


_clipped_relu_jit = jax.jit(clipped_relu_pallas)


class ClippedReLU:
    """JAX/Pallas equivalent of the PyTorch ClippedReLU module."""

    def __init__(self, threshold_x: float):
        self.threshold_x = float(threshold_x)

    def __call__(self, x: jax.Array) -> jax.Array:
        # Threshold passed as a traced scalar: no recompile per threshold value.
        thr = jnp.asarray(self.threshold_x, dtype=x.dtype)
        return _clipped_relu_jit(x, thr)


if __name__ == "__main__":
    key = jax.random.PRNGKey(0)
    threshold_x = 0.25
    module = ClippedReLU(threshold_x)

    # NCHW input, small shape -> exercises the Pallas path (2048 elems, grid=2).
    x = jax.random.normal(key, (2, 4, 16, 16), dtype=jnp.float32)
    out = jax.block_until_ready(module(x))
    ref = jnp.where(x <= threshold_x, jnp.zeros_like(x), x)
    assert out.shape == x.shape and out.dtype == x.dtype
    assert jnp.allclose(out, ref), "mismatch vs reference (kernel path)"

    # Slightly larger NCHW input: multi-block Pallas path.
    k2, k3 = jax.random.split(key)
    x2 = jax.random.normal(k2, (4, 8, 32, 32), dtype=jnp.float32)
    out2 = jax.block_until_ready(module(x2))
    ref2 = jnp.where(x2 <= threshold_x, jnp.zeros_like(x2), x2)
    assert jnp.allclose(out2, ref2), "mismatch vs reference (multi-block path)"

    # Non-multiple-of-128 flat size: wrapper fast path.
    x3 = jax.random.normal(k3, (3, 5, 7, 11), dtype=jnp.float32)
    out3 = jax.block_until_ready(module(x3))
    ref3 = jnp.where(x3 <= threshold_x, jnp.zeros_like(x3), x3)
    assert jnp.allclose(out3, ref3), "mismatch vs reference (fallback path)"

    # Different threshold on the same shape: should NOT recompile (traced scalar).
    module2 = ClippedReLU(-0.5)
    out4 = jax.block_until_ready(module2(x))
    ref4 = jnp.where(x <= -0.5, jnp.zeros_like(x), x)
    assert jnp.allclose(out4, ref4), "mismatch vs reference (second threshold)"

    print("KERNEL_OK")
</pallas_src>

<mosaic_0001>
module attributes {stable_mosaic.version = 11 : i64} {
  func.func @_clipped_relu_kernel(%arg0: i32, %arg1: memref<1xf32, #tpu.memory_space<smem>>, %arg2: memref<8x128xf32, #tpu.memory_space<vmem>>, %arg3: memref<8x128xf32, #tpu.memory_space<vmem>>) attributes {dimension_semantics = [#tpu.dimension_semantics<parallel>], iteration_bounds = array<i64: 2>, scalar_prefetch = 0 : i64, scratch_operands = 0 : i64, tpu.core_type = #tpu.core_type<tc>, window_params = [{transform_indices = @transform_0, window_bounds = array<i64: 1>}, {transform_indices = @transform_1, window_bounds = array<i64: 8, 128>}, {transform_indices = @transform_2, window_bounds = array<i64: 8, 128>}]} {
    %c0 = arith.constant 0 : index
    %0 = memref.load %arg1[%c0] : memref<1xf32, #tpu.memory_space<smem>>
    %c0_0 = arith.constant 0 : index
    %c0_1 = arith.constant 0 : index
    %1 = vector.load %arg2[%c0_0, %c0_1] : memref<8x128xf32, #tpu.memory_space<vmem>>, vector<8x128xf32>
    %2 = vector.broadcast %0 : f32 to vector<8x128xf32>
    %3 = arith.cmpf ole, %1, %2 : vector<8x128xf32>
    %cst = arith.constant 0.000000e+00 : f32
    %4 = vector.broadcast %cst : f32 to vector<8x128xf32>
    %5 = arith.select %3, %4, %1 : vector<8x128xi1>, vector<8x128xf32>
    %c0_2 = arith.constant 0 : index
    %c0_3 = arith.constant 0 : index
    %6 = vector.load %arg3[%c0_2, %c0_3] : memref<8x128xf32, #tpu.memory_space<vmem>>, vector<8x128xf32>
    tpu.vector_store %arg3[%c0_2, %c0_3], %5 {strides = array<i32>} : memref<8x128xf32, #tpu.memory_space<vmem>>, vector<8x128xf32>,
    return
  }
  func.func @transform_0(%arg0: i32) -> i32 {
    %c0_i32 = arith.constant 0 : i32
    %c0_i32_0 = arith.constant 0 : i32
    return %c0_i32 : i32
  }
  func.func @transform_1(%arg0: i32) -> (i32, i32) {
    %c0_i32 = arith.constant 0 : i32
    %c0_i32_0 = arith.constant 0 : i32
    return %arg0, %c0_i32 : i32, i32
  }
  func.func @transform_2(%arg0: i32) -> (i32, i32) {
    %c0_i32 = arith.constant 0 : i32
    %c0_i32_0 = arith.constant 0 : i32
    return %arg0, %c0_i32 : i32, i32
  }
}

</mosaic_0001>

<bundles_post_ra>
// kernel: clipped_relu_pallas.1
= control target key start
LH: loop header
LB: loop body
LE: loop exit
PB: predicated region body
PF: predicated region fallthrough
CT: control target
= control target key end

     0   :  { %s220_s11 = smov 0   ;;  %s248_s0 = inlined_call_operand.<no memory space> [shape: f32[1], index: 0, kind: input, shape index: {}]   ;;  %s249_s1 = inlined_call_operand.vmem [shape: f32[16,128], index: 1, kind: input, shape index: {}]   ;;  %s250_s2 = inlined_call_operand.vmem [shape: f32[16,128], index: 2, kind: output, shape index: {}]  }
   0x1   :  { %7 = sst [smem:[#allocation2]] %s248_s0 }
   0x2 LB: > { %s199_s12 = sadd.s32 4294967295, %s222_s11   ;;  %p203_p0 = scmp.ge.s32.totalorder %s222_s11, 1  ;;  %s222_s11 = sphi %s220_s11, %s13_s11  }
   0x3   : > { %p112_p1 = scmp.lt.s32.totalorder %s222_s11, 3 }
   0x5   : > { %p113_p2 = pnand %p203_p0, %p112_p1 }
   0x6   : > { %p132_p3 = scmp.lt.s32.totalorder (!%p113_p2), %s199_s12, 1  ;;  %s140_s13 = sld [smem:[#allocation2]] (!%p113_p2) }
   0x7   : > { %116 = sbr.rel (%p113_p2) target bundleno = 19 (0x13), region = 28 }
   0xc   : > { %s252_s12 = smov (!%p132_p3, %s199_s12), 1  ;;  %v142_v1 = vstv %s140_s13 }
   0xd   : > { %s204_s14 = sshll.u32 %s252_s12, 3 }
   0xe   : > { %s135_s17 = scalar_lea.vmem %s249_s1, %s204_s14  ;;  %s139_s0 = scalar_lea.vmem %s250_s2, %s204_s14 }
   0xf   : > { %v141_v0 = vld [vmem:[%s135_s17] sm:$0xff] }
  0x10   : > { %vm143_vm0 = vcmp.le.f32.partialorder %v141_v0, %v142_v1 }
  0x11   : > { %v144_v2 = vsel %vm143_vm0, 0.0, %v141_v0 }
  0x12   : > { %145 = vst [vmem:[%s139_s0] sm:$0xff] %v144_v2 }
  0x13 PF: > { %s13_s11 = sadd.s32 1, %s222_s11  }
  0x14   : > { %p10_p4 = scmp.ge.s32.totalorder %s13_s11, 4  }
  0x16   :  { %12 = sbr.rel (!%p10_p4) target bundleno = 2 (0x2), region = 58 }

</bundles_post_ra>
